<compile_context>
chip_gen: v7x
topology: tpu7x:2x2x1
jax: 0.10.0
libtpu: 0.0.40
codegen_flags: <defaults>
</compile_context>

<pallas_src>
import functools

import jax
import jax.numpy as jnp
import numpy as np
from jax.experimental import pallas as pl
from jax.experimental.pallas import tpu as pltpu


# ---------------- fused conv3x3 (+ optional input BN/ReLU) + BN stats -------

def _conv_bn_stats_kernel(x_ref, t_ref, b_ref, scale_ref, shift_ref,
                          o_ref, psum_ref, psq_ref, xw_ref,
                          *, B, H, WCin, WCout, apply_input_act):
    # x_ref     : (B, H, W*Cin)        activations, channel-fastest lanes
    # t_ref     : (3*W*Cin, W*Cout)    block-Toeplitz weights, bf16
    # b_ref     : (1, W*Cout)          bias, tiled along W (f32)
    # scale_ref : (1, W*Cin)           input BN scale (tiled along W, f32)
    # shift_ref : (1, W*Cin)           input BN shift (tiled along W, f32)
    # o_ref     : (B, H, W*Cout)       conv output (pre-BN)
    # psum_ref  : (1, 1, W*Cout)       per-step channel partial sums (f32)
    # psq_ref   : (1, 1, W*Cout)       per-step channel partial sum of sq
    # xw_ref    : (B*H, 3*W*Cin) f32   "wide" im2row operand: the 3 vertical
    #                                  taps side by side in lanes; horizontal
    #                                  taps are folded into the weight.
    x = x_ref[...].astype(jnp.float32)                      # (B, H, W*Cin)
    if apply_input_act:
        # Fused previous-layer BatchNorm (precomputed scale/shift) + ReLU,
        # applied before the (implicit) zero padding -> matches PyTorch order.
        x = jnp.maximum(x * scale_ref[...] + shift_ref[...], 0.0)

    zero_row = jnp.zeros((1, WCin), jnp.float32)
    for img in range(B):                                    # B is small/static
        base = img * H
        xi = x[img]                                         # (H, W*Cin)
        # centre tap (ky=1): output row h reads image row h
        xw_ref[base:base + H, WCin:2 * WCin] = xi
        # top tap (ky=0): output row h reads image row h-1 (row 0 = halo)
        xw_ref[base:base + 1, 0:WCin] = zero_row
        xw_ref[base + 1:base + H, 0:WCin] = xi[:H - 1]
        # bottom tap (ky=2): output row h reads image row h+1 (row H-1 = halo)
        xw_ref[base:base + H - 1, 2 * WCin:3 * WCin] = xi[1:]
        xw_ref[base + H - 1:base + H, 2 * WCin:3 * WCin] = zero_row

    # One wide-K MXU matmul: (B*H, 3*W*Cin) x (3*W*Cin, W*Cout), f32 accumulate.
    xw = xw_ref[...].astype(jnp.bfloat16)
    acc = jnp.dot(xw, t_ref[...], preferred_element_type=jnp.float32)
    acc = acc + b_ref[...]                                  # (B*H, W*Cout)

    o_ref[...] = acc.reshape(B, H, WCout).astype(o_ref.dtype)
    # Fused BatchNorm statistics of the conv output (reduced over this step's
    # B*H rows here; over steps and W in the wrapper).
    psum_ref[0] = jnp.sum(acc, axis=0, keepdims=True)
    psq_ref[0] = jnp.sum(acc * acc, axis=0, keepdims=True)


def _toeplitz_weights(w, W):
    """(3, 3, Cin, Cout) conv weights -> (3*W*Cin, W*Cout) Toeplitz matrix.

    Row index = ky*(W*Cin) + wi*Cin + ci, col index = wo*Cout + co, value
    w[ky, wi-wo+1, ci, co] when wi-wo+1 in {0,1,2} and wi is inside the image;
    horizontal zero padding is implicit in the zero rows.
    """
    KH, KW, Cin, Cout = w.shape
    sel = np.zeros((KW, W, W), np.float32)
    for kx in range(KW):
        for wo in range(W):
            wi = wo + kx - 1
            if 0 <= wi < W:
                sel[kx, wi, wo] = 1.0
    t = jnp.einsum('xpw,yxio->ypiwo', jnp.asarray(sel), w.astype(jnp.float32))
    return t.reshape(KH * W * Cin, W * Cout)


def _pick_images_per_step(N, H, target_rows=256):
    """Largest divisor B of N with B*H <= target_rows rows per MXU call,
    keeping >= 2 grid steps whenever N >= 2 (v7x has two TensorCores; the
    extra step costs ~nothing on single-TC v5e/v6e)."""
    best = 1
    for cand in range(1, N + 1):
        if N % cand != 0:
            continue
        if cand * H > target_rows:
            break
        if N >= 2 and (N // cand) < 2:
            continue
        best = cand
    return best


def conv3x3_bn_stats(x_flat, w, b, W, in_scale=None, in_shift=None,
                     out_dtype=jnp.bfloat16):
    """3x3 conv (stride 1, zero pad 1) on (N, H, W*Cin)-layout activations.

    Optionally applies a fused `relu(x * in_scale + in_shift)` input prologue
    (the previous layer's BatchNorm + ReLU).  Returns the conv output in
    (N, H, W*Cout) layout plus per-channel sum / sum-of-squares of that
    output (the statistics needed for this layer's BatchNorm).
    """
    N, H, WCin = x_flat.shape
    Cout = w.shape[-1]
    WCout = W * Cout
    K3 = 3 * WCin

    B = _pick_images_per_step(N, H)
    steps = N // B

    t = _toeplitz_weights(w, W).astype(jnp.bfloat16)        # (3*W*Cin, W*Cout)
    bias_row = jnp.tile(b.astype(jnp.float32), W).reshape(1, WCout)
    apply_act = in_scale is not None
    if apply_act:
        scale_row = jnp.tile(in_scale.astype(jnp.float32), W).reshape(1, WCin)
        shift_row = jnp.tile(in_shift.astype(jnp.float32), W).reshape(1, WCin)
    else:
        scale_row = jnp.ones((1, WCin), jnp.float32)
        shift_row = jnp.zeros((1, WCin), jnp.float32)

    kernel = functools.partial(_conv_bn_stats_kernel, B=B, H=H, WCin=WCin,
                               WCout=WCout, apply_input_act=apply_act)

    flops = 2 * N * H * K3 * WCout
    bytes_accessed = (int(x_flat.size) * x_flat.dtype.itemsize
                      + int(t.size) * 2
                      + N * H * WCout * jnp.dtype(out_dtype).itemsize
                      + 2 * steps * WCout * 4
                      + (WCout + 2 * WCin) * 4)

    out, psum, psq = pl.pallas_call(
        kernel,
        out_shape=(jax.ShapeDtypeStruct((N, H, WCout), out_dtype),
                   jax.ShapeDtypeStruct((steps, 1, WCout), jnp.float32),
                   jax.ShapeDtypeStruct((steps, 1, WCout), jnp.float32)),
        grid=(steps,),
        in_specs=[
            pl.BlockSpec((B, H, WCin), lambda n: (n, 0, 0)),
            pl.BlockSpec((K3, WCout), lambda n: (0, 0)),
            pl.BlockSpec((1, WCout), lambda n: (0, 0)),
            pl.BlockSpec((1, WCin), lambda n: (0, 0)),
            pl.BlockSpec((1, WCin), lambda n: (0, 0)),
        ],
        out_specs=(
            pl.BlockSpec((B, H, WCout), lambda n: (n, 0, 0)),
            pl.BlockSpec((1, 1, WCout), lambda n: (n, 0, 0)),
            pl.BlockSpec((1, 1, WCout), lambda n: (n, 0, 0)),
        ),
        scratch_shapes=[pltpu.VMEM((B * H, K3), jnp.float32)],
        compiler_params=pltpu.CompilerParams(
            dimension_semantics=("parallel",)),
        cost_estimate=pl.CostEstimate(flops=flops, transcendentals=0,
                                      bytes_accessed=bytes_accessed),
    )(x_flat, t, bias_row, scale_row, shift_row)

    # Fold the per-step, per-(w, c) partial sums down to per-channel stats.
    ch_sum = psum.reshape(steps, W, Cout).sum(axis=(0, 1))
    ch_sq = psq.reshape(steps, W, Cout).sum(axis=(0, 1))
    return out, ch_sum, ch_sq


def _bn_scale_shift(ch_sum, ch_sq, gamma, beta, count, eps=1e-5):
    """Train-mode BatchNorm: fold batch stats + affine into scale/shift."""
    mean = ch_sum / count
    var = jnp.maximum(ch_sq / count - mean * mean, 0.0)     # biased variance
    scale = gamma / jnp.sqrt(var + eps)
    shift = beta - mean * scale
    return scale, shift


# ------------------------- final BatchNorm + ReLU ---------------------------

def _bn_relu_kernel(y_ref, scale_ref, shift_ref, o_ref):
    y = y_ref[...].astype(jnp.float32)
    o_ref[...] = jnp.maximum(y * scale_ref[...] + shift_ref[...],
                             0.0).astype(o_ref.dtype)


def _pick_rows_block(rows, cols, itemsize=4, max_block_bytes=2 * 1024 * 1024):
    """Row block under a conservative VMEM budget (v5e-safe): either the full
    extent (always legal) or a fixed 8-aligned block used with a cdiv grid."""
    budget = max(8, (max_block_bytes // max(1, cols * itemsize)) // 8 * 8)
    if rows <= budget:
        return rows
    return budget


def bn_relu(y_flat, scale, shift, W, out_dtype=jnp.float32):
    """Fused BatchNorm (precomputed scale/shift) + ReLU on (N, H, W*C)."""
    N, H, WC = y_flat.shape
    rows = N * H
    y2d = y_flat.reshape(rows, WC)            # lane-dense: last dim = W*C
    scale_row = jnp.tile(scale.astype(jnp.float32), W).reshape(1, WC)
    shift_row = jnp.tile(shift.astype(jnp.float32), W).reshape(1, WC)
    br = _pick_rows_block(rows, WC)
    grid = (pl.cdiv(rows, br),)               # ragged tail handled by Pallas
    out2d = pl.pallas_call(
        _bn_relu_kernel,
        out_shape=jax.ShapeDtypeStruct((rows, WC), out_dtype),
        grid=grid,
        in_specs=[pl.BlockSpec((br, WC), lambda i: (i, 0)),
                  pl.BlockSpec((1, WC), lambda i: (0, 0)),
                  pl.BlockSpec((1, WC), lambda i: (0, 0))],
        out_specs=pl.BlockSpec((br, WC), lambda i: (i, 0)),
        compiler_params=pltpu.CompilerParams(
            dimension_semantics=("parallel",)),
    )(y2d, scale_row, shift_row)
    return out2d.reshape(N, H, WC)


# ------------------------------- DoubleConv ---------------------------------

def init_double_conv_params(key, in_channels, out_channels):
    """Deterministic init mirroring the PyTorch module's shapes/init style."""
    ks = jax.random.split(key, 6)
    fan_in1 = in_channels * 9
    fan_in2 = out_channels * 9
    # Conv weights: kaiming_normal_(a=0, mode='fan_in') -> std = sqrt(2/fan_in)
    w1 = jax.random.normal(ks[0], (3, 3, in_channels, out_channels),
                           jnp.float32) * jnp.sqrt(2.0 / fan_in1)
    w2 = jax.random.normal(ks[1], (3, 3, out_channels, out_channels),
                           jnp.float32) * jnp.sqrt(2.0 / fan_in2)
    # Conv biases: PyTorch default uniform(-1/sqrt(fan_in), 1/sqrt(fan_in))
    b1 = jax.random.uniform(ks[2], (out_channels,), jnp.float32,
                            -1.0, 1.0) / jnp.sqrt(fan_in1)
    b2 = jax.random.uniform(ks[3], (out_channels,), jnp.float32,
                            -1.0, 1.0) / jnp.sqrt(fan_in2)
    # BatchNorm: weight ~ N(1.0, 0.02), bias = 0
    g1 = 1.0 + 0.02 * jax.random.normal(ks[4], (out_channels,), jnp.float32)
    g2 = 1.0 + 0.02 * jax.random.normal(ks[5], (out_channels,), jnp.float32)
    beta1 = jnp.zeros((out_channels,), jnp.float32)
    beta2 = jnp.zeros((out_channels,), jnp.float32)
    return dict(w1=w1, b1=b1, g1=g1, beta1=beta1,
                w2=w2, b2=b2, g2=g2, beta2=beta2)


@jax.jit
def double_conv_forward(x_nchw, params):
    N, Cin, H, W = x_nchw.shape
    Cout = params["w1"].shape[-1]
    count = N * H * W

    # NCHW (PyTorch) -> lane-dense (N, H, W*C) kernel layout, stored in bf16
    # (the MXU operand dtype) so the transposed copy through HBM is half-width.
    x = jnp.transpose(x_nchw, (0, 2, 3, 1)).reshape(
        N, H, W * Cin).astype(jnp.bfloat16)

    # conv1 (+ fused BN1 statistics).  y1 is stored in bf16.
    y1, s1, q1 = conv3x3_bn_stats(x, params["w1"], params["b1"], W)
    scale1, shift1 = _bn_scale_shift(s1, q1, params["g1"], params["beta1"],
                                     count)

    # conv2 with BN1+ReLU fused into its input prologue (+ fused BN2 stats).
    y2, s2, q2 = conv3x3_bn_stats(y1, params["w2"], params["b2"], W,
                                  in_scale=scale1, in_shift=shift1)
    scale2, shift2 = _bn_scale_shift(s2, q2, params["g2"], params["beta2"],
                                     count)

    # Final fused BN2 + ReLU (lane-dense elementwise pass, f32 output).
    out = bn_relu(y2, scale2, shift2, W)
    return out.reshape(N, H, W, Cout).transpose(0, 3, 1, 2)


# --------------------------- pure-JAX reference -----------------------------

def _reference_forward(x_nchw, params, eps=1e-5):
    x = jnp.transpose(x_nchw, (0, 2, 3, 1))

    def conv(x, w, b):
        y = jax.lax.conv_general_dilated(
            x, w, window_strides=(1, 1), padding=((1, 1), (1, 1)),
            dimension_numbers=("NHWC", "HWIO", "NHWC"),
            precision=jax.lax.Precision.HIGHEST)
        return y + b

    def bn_relu_ref(y, g, beta):
        m = y.mean(axis=(0, 1, 2))
        v = y.var(axis=(0, 1, 2))
        return jnp.maximum((y - m) * (g / jnp.sqrt(v + eps)) + beta, 0.0)

    y = bn_relu_ref(conv(x, params["w1"], params["b1"]),
                    params["g1"], params["beta1"])
    y = bn_relu_ref(conv(y, params["w2"], params["b2"]),
                    params["g2"], params["beta2"])
    return jnp.transpose(y, (0, 3, 1, 2))


if __name__ == "__main__":
    key = jax.random.PRNGKey(0)
    kx, kp = jax.random.split(key)
    in_channels, out_channels = 4, 8
    x = jax.random.normal(kx, (2, in_channels, 16, 16), jnp.float32)
    params = init_double_conv_params(kp, in_channels, out_channels)

    out = double_conv_forward(x, params)
    out = jax.block_until_ready(out)

    assert out.shape == (2, out_channels, 16, 16), out.shape
    assert bool(jnp.all(out >= 0.0))          # ReLU output is non-negative
    assert bool(jnp.all(jnp.isfinite(out)))

    ref = _reference_forward(x, params)
    # bf16 MXU operands + bf16 intermediate storage -> widened tolerance
    # vs. the f32 reference (BN renormalizes, so the error stays small).
    max_err = float(jnp.max(jnp.abs(out - ref)))
    assert bool(jnp.allclose(out, ref, atol=5e-2, rtol=5e-2)), max_err
    print("KERNEL_OK")
</pallas_src>

<mosaic_0001>
module attributes {stable_mosaic.version = 11 : i64} {
  func.func @_conv_bn_stats_kernel(%arg0: i32, %arg1: memref<1x16x64xbf16, #tpu.memory_space<vmem>>, %arg2: memref<192x128xbf16, #tpu.memory_space<vmem>>, %arg3: memref<1x128xf32, #tpu.memory_space<vmem>>, %arg4: memref<1x64xf32, #tpu.memory_space<vmem>>, %arg5: memref<1x64xf32, #tpu.memory_space<vmem>>, %arg6: memref<1x16x128xbf16, #tpu.memory_space<vmem>>, %arg7: memref<1x1x128xf32, #tpu.memory_space<vmem>>, %arg8: memref<1x1x128xf32, #tpu.memory_space<vmem>>, %arg9: memref<16x192xf32, #tpu.memory_space<vmem>>) attributes {dimension_semantics = [#tpu.dimension_semantics<parallel>], iteration_bounds = array<i64: 2>, scalar_prefetch = 0 : i64, scratch_operands = 1 : i64, tpu.core_type = #tpu.core_type<tc>, window_params = [{transform_indices = @transform_0, window_bounds = array<i64: 1, 16, 64>}, {pipeline_mode = #tpu.pipeline_mode<synchronous>, transform_indices = @transform_1, window_bounds = array<i64: 192, 128>}, {pipeline_mode = #tpu.pipeline_mode<synchronous>, transform_indices = @transform_2, window_bounds = array<i64: 1, 128>}, {pipeline_mode = #tpu.pipeline_mode<synchronous>, transform_indices = @transform_3, window_bounds = array<i64: 1, 64>}, {pipeline_mode = #tpu.pipeline_mode<synchronous>, transform_indices = @transform_4, window_bounds = array<i64: 1, 64>}, {transform_indices = @transform_5, window_bounds = array<i64: 1, 16, 128>}, {transform_indices = @transform_6, window_bounds = array<i64: 1, 1, 128>}, {transform_indices = @transform_7, window_bounds = array<i64: 1, 1, 128>}]} {
    %c0 = arith.constant 0 : index
    %c0_0 = arith.constant 0 : index
    %c0_1 = arith.constant 0 : index
    %0 = vector.load %arg1[%c0, %c0_0, %c0_1] : memref<1x16x64xbf16, #tpu.memory_space<vmem>>, vector<1x16x64xbf16>
    %1 = arith.extf %0 : vector<1x16x64xbf16> to vector<1x16x64xf32>
    %cst = arith.constant 0.000000e+00 : f32
    %2 = vector.broadcast %cst : f32 to vector<1x64xf32>
    %3 = vector.shape_cast %1 : vector<1x16x64xf32> to vector<16x64xf32>
    %c0_2 = arith.constant 0 : index
    %c64 = arith.constant 64 : index
    %4 = vector.load %arg9[%c0_2, %c64] : memref<16x192xf32, #tpu.memory_space<vmem>>, vector<16x64xf32>
    tpu.vector_store %arg9[%c0_2, %c64], %3 {strides = array<i32>} : memref<16x192xf32, #tpu.memory_space<vmem>>, vector<16x64xf32>,
    %c0_3 = arith.constant 0 : index
    %c0_4 = arith.constant 0 : index
    %5 = vector.load %arg9[%c0_3, %c0_4] : memref<16x192xf32, #tpu.memory_space<vmem>>, vector<1x64xf32>
    tpu.vector_store %arg9[%c0_3, %c0_4], %2 {strides = array<i32>} : memref<16x192xf32, #tpu.memory_space<vmem>>, vector<1x64xf32>,
    %6 = vector.extract_strided_slice %3 {offsets = [0, 0], sizes = [15, 64], strides = [1, 1]} : vector<16x64xf32> to vector<15x64xf32>
    %c1 = arith.constant 1 : index
    %c0_5 = arith.constant 0 : index
    %7 = vector.load %arg9[%c1, %c0_5] : memref<16x192xf32, #tpu.memory_space<vmem>>, vector<15x64xf32>
    tpu.vector_store %arg9[%c1, %c0_5], %6 {strides = array<i32>} : memref<16x192xf32, #tpu.memory_space<vmem>>, vector<15x64xf32>,
    %8 = vector.extract_strided_slice %3 {offsets = [1, 0], sizes = [15, 64], strides = [1, 1]} : vector<16x64xf32> to vector<15x64xf32>
    %c0_6 = arith.constant 0 : index
    %c128 = arith.constant 128 : index
    %9 = vector.load %arg9[%c0_6, %c128] : memref<16x192xf32, #tpu.memory_space<vmem>>, vector<15x64xf32>
    tpu.vector_store %arg9[%c0_6, %c128], %8 {strides = array<i32>} : memref<16x192xf32, #tpu.memory_space<vmem>>, vector<15x64xf32>,
    %c15 = arith.constant 15 : index
    %c128_7 = arith.constant 128 : index
    %10 = vector.load %arg9[%c15, %c128_7] : memref<16x192xf32, #tpu.memory_space<vmem>>, vector<1x64xf32>
    tpu.vector_store %arg9[%c15, %c128_7], %2 {strides = array<i32>} : memref<16x192xf32, #tpu.memory_space<vmem>>, vector<1x64xf32>,
    %c0_8 = arith.constant 0 : index
    %c0_9 = arith.constant 0 : index
    %11 = vector.load %arg9[%c0_8, %c0_9] : memref<16x192xf32, #tpu.memory_space<vmem>>, vector<16x192xf32>
    %12 = arith.truncf %11 : vector<16x192xf32> to vector<16x192xbf16>
    %c0_10 = arith.constant 0 : index
    %c0_11 = arith.constant 0 : index
    %13 = vector.load %arg2[%c0_10, %c0_11] : memref<192x128xbf16, #tpu.memory_space<vmem>>, vector<192x128xbf16>
    %cst_12 = arith.constant dense<0.000000e+00> : vector<16x128xf32>
    %14 = tpu.matmul %12, %13, %cst_12 {dimension_numbers = #tpu.dot_dimension_numbers<[1], [0], [0], [1], [0, 0, 1, 1], [], []>} : vector<16x192xbf16>, vector<192x128xbf16>, vector<16x128xf32> -> vector<16x128xf32>
    %c0_13 = arith.constant 0 : index
    %c0_14 = arith.constant 0 : index
    %15 = vector.load %arg3[%c0_13, %c0_14] : memref<1x128xf32, #tpu.memory_space<vmem>>, vector<1x128xf32>
    %16 = vector.broadcast %15 : vector<1x128xf32> to vector<16x128xf32>
    %17 = arith.addf %14, %16 : vector<16x128xf32>
    %18 = vector.shape_cast %17 : vector<16x128xf32> to vector<1x16x128xf32>
    %19 = arith.truncf %18 : vector<1x16x128xf32> to vector<1x16x128xbf16>
    %c0_15 = arith.constant 0 : index
    %c0_16 = arith.constant 0 : index
    %c0_17 = arith.constant 0 : index
    %20 = vector.load %arg6[%c0_15, %c0_16, %c0_17] : memref<1x16x128xbf16, #tpu.memory_space<vmem>>, vector<1x16x128xbf16>
    tpu.vector_store %arg6[%c0_15, %c0_16, %c0_17], %19 {strides = array<i32>} : memref<1x16x128xbf16, #tpu.memory_space<vmem>>, vector<1x16x128xbf16>,
    %cst_18 = arith.constant dense<0.000000e+00> : vector<128xf32>
    %21 = vector.multi_reduction <add>, %17, %cst_18 [0] : vector<16x128xf32> to vector<128xf32>
    %22 = vector.shape_cast %21 : vector<128xf32> to vector<1x128xf32>
    %c0_19 = arith.constant 0 : index
    %c0_20 = arith.constant 0 : index
    %c0_21 = arith.constant 0 : index
    %23 = vector.load %arg7[%c0_19, %c0_20, %c0_21] : memref<1x1x128xf32, #tpu.memory_space<vmem>>, vector<1x1x128xf32>
    %24 = vector.shape_cast %23 : vector<1x1x128xf32> to vector<1x128xf32>
    %25 = vector.shape_cast %22 : vector<1x128xf32> to vector<1x1x128xf32>
    tpu.vector_store %arg7[%c0_19, %c0_20, %c0_21], %25 {strides = array<i32>} : memref<1x1x128xf32, #tpu.memory_space<vmem>>, vector<1x1x128xf32>,
    %26 = arith.mulf %17, %17 : vector<16x128xf32>
    %cst_22 = arith.constant dense<0.000000e+00> : vector<128xf32>
    %27 = vector.multi_reduction <add>, %26, %cst_22 [0] : vector<16x128xf32> to vector<128xf32>
    %28 = vector.shape_cast %27 : vector<128xf32> to vector<1x128xf32>
    %c0_23 = arith.constant 0 : index
    %c0_24 = arith.constant 0 : index
    %c0_25 = arith.constant 0 : index
    %29 = vector.load %arg8[%c0_23, %c0_24, %c0_25] : memref<1x1x128xf32, #tpu.memory_space<vmem>>, vector<1x1x128xf32>
    %30 = vector.shape_cast %29 : vector<1x1x128xf32> to vector<1x128xf32>
    %31 = vector.shape_cast %28 : vector<1x128xf32> to vector<1x1x128xf32>
    tpu.vector_store %arg8[%c0_23, %c0_24, %c0_25], %31 {strides = array<i32>} : memref<1x1x128xf32, #tpu.memory_space<vmem>>, vector<1x1x128xf32>,
    return
  }
  func.func @transform_0(%arg0: i32) -> (i32, i32, i32) {
    %c0_i32 = arith.constant 0 : i32
    %c0_i32_0 = arith.constant 0 : i32
    %c0_i32_1 = arith.constant 0 : i32
    return %arg0, %c0_i32, %c0_i32_0 : i32, i32, i32
  }
  func.func @transform_1(%arg0: i32) -> (i32, i32) {
    %c0_i32 = arith.constant 0 : i32
    %c0_i32_0 = arith.constant 0 : i32
    %c0_i32_1 = arith.constant 0 : i32
    return %c0_i32, %c0_i32_0 : i32, i32
  }
  func.func @transform_2(%arg0: i32) -> (i32, i32) {
    %c0_i32 = arith.constant 0 : i32
    %c0_i32_0 = arith.constant 0 : i32
    %c0_i32_1 = arith.constant 0 : i32
    return %c0_i32, %c0_i32_0 : i32, i32
  }
  func.func @transform_3(%arg0: i32) -> (i32, i32) {
    %c0_i32 = arith.constant 0 : i32
    %c0_i32_0 = arith.constant 0 : i32
    %c0_i32_1 = arith.constant 0 : i32
    return %c0_i32, %c0_i32_0 : i32, i32
  }
  func.func @transform_4(%arg0: i32) -> (i32, i32) {
    %c0_i32 = arith.constant 0 : i32
    %c0_i32_0 = arith.constant 0 : i32
    %c0_i32_1 = arith.constant 0 : i32
    return %c0_i32, %c0_i32_0 : i32, i32
  }
  func.func @transform_5(%arg0: i32) -> (i32, i32, i32) {
    %c0_i32 = arith.constant 0 : i32
    %c0_i32_0 = arith.constant 0 : i32
    %c0_i32_1 = arith.constant 0 : i32
    return %arg0, %c0_i32, %c0_i32_0 : i32, i32, i32
  }
  func.func @transform_6(%arg0: i32) -> (i32, i32, i32) {
    %c0_i32 = arith.constant 0 : i32
    %c0_i32_0 = arith.constant 0 : i32
    %c0_i32_1 = arith.constant 0 : i32
    return %arg0, %c0_i32, %c0_i32_0 : i32, i32, i32
  }
  func.func @transform_7(%arg0: i32) -> (i32, i32, i32) {
    %c0_i32 = arith.constant 0 : i32
    %c0_i32_0 = arith.constant 0 : i32
    %c0_i32_1 = arith.constant 0 : i32
    return %arg0, %c0_i32, %c0_i32_0 : i32, i32, i32
  }
}

module attributes {stable_mosaic.version = 11 : i64} {
  func.func @_conv_bn_stats_kernel(%arg0: i32, %arg1: memref<1x16x128xbf16, #tpu.memory_space<vmem>>, %arg2: memref<384x128xbf16, #tpu.memory_space<vmem>>, %arg3: memref<1x128xf32, #tpu.memory_space<vmem>>, %arg4: memref<1x128xf32, #tpu.memory_space<vmem>>, %arg5: memref<1x128xf32, #tpu.memory_space<vmem>>, %arg6: memref<1x16x128xbf16, #tpu.memory_space<vmem>>, %arg7: memref<1x1x128xf32, #tpu.memory_space<vmem>>, %arg8: memref<1x1x128xf32, #tpu.memory_space<vmem>>, %arg9: memref<16x384xf32, #tpu.memory_space<vmem>>) attributes {dimension_semantics = [#tpu.dimension_semantics<parallel>], iteration_bounds = array<i64: 2>, scalar_prefetch = 0 : i64, scratch_operands = 1 : i64, tpu.core_type = #tpu.core_type<tc>, window_params = [{transform_indices = @transform_0, window_bounds = array<i64: 1, 16, 128>}, {pipeline_mode = #tpu.pipeline_mode<synchronous>, transform_indices = @transform_1, window_bounds = array<i64: 384, 128>}, {pipeline_mode = #tpu.pipeline_mode<synchronous>, transform_indices = @transform_2, window_bounds = array<i64: 1, 128>}, {pipeline_mode = #tpu.pipeline_mode<synchronous>, transform_indices = @transform_3, window_bounds = array<i64: 1, 128>}, {pipeline_mode = #tpu.pipeline_mode<synchronous>, transform_indices = @transform_4, window_bounds = array<i64: 1, 128>}, {transform_indices = @transform_5, window_bounds = array<i64: 1, 16, 128>}, {transform_indices = @transform_6, window_bounds = array<i64: 1, 1, 128>}, {transform_indices = @transform_7, window_bounds = array<i64: 1, 1, 128>}]} {
    %c0 = arith.constant 0 : index
    %c0_0 = arith.constant 0 : index
    %c0_1 = arith.constant 0 : index
    %0 = vector.load %arg1[%c0, %c0_0, %c0_1] : memref<1x16x128xbf16, #tpu.memory_space<vmem>>, vector<1x16x128xbf16>
    %1 = arith.extf %0 : vector<1x16x128xbf16> to vector<1x16x128xf32>
    %c0_2 = arith.constant 0 : index
    %c0_3 = arith.constant 0 : index
    %2 = vector.load %arg4[%c0_2, %c0_3] : memref<1x128xf32, #tpu.memory_space<vmem>>, vector<1x128xf32>
    %3 = vector.shape_cast %2 : vector<1x128xf32> to vector<1x1x128xf32>
    %4 = vector.broadcast %3 : vector<1x1x128xf32> to vector<1x16x128xf32>
    %5 = arith.mulf %1, %4 : vector<1x16x128xf32>
    %c0_4 = arith.constant 0 : index
    %c0_5 = arith.constant 0 : index
    %6 = vector.load %arg5[%c0_4, %c0_5] : memref<1x128xf32, #tpu.memory_space<vmem>>, vector<1x128xf32>
    %7 = vector.shape_cast %6 : vector<1x128xf32> to vector<1x1x128xf32>
    %8 = vector.broadcast %7 : vector<1x1x128xf32> to vector<1x16x128xf32>
    %9 = arith.addf %5, %8 : vector<1x16x128xf32>
    %cst = arith.constant 0.000000e+00 : f32
    %10 = vector.broadcast %cst : f32 to vector<1x16x128xf32>
    %11 = arith.maximumf %9, %10 : vector<1x16x128xf32>
    %cst_6 = arith.constant 0.000000e+00 : f32
    %12 = vector.broadcast %cst_6 : f32 to vector<1x128xf32>
    %13 = vector.shape_cast %11 : vector<1x16x128xf32> to vector<16x128xf32>
    %c0_7 = arith.constant 0 : index
    %c128 = arith.constant 128 : index
    %14 = vector.load %arg9[%c0_7, %c128] : memref<16x384xf32, #tpu.memory_space<vmem>>, vector<16x128xf32>
    tpu.vector_store %arg9[%c0_7, %c128], %13 {strides = array<i32>} : memref<16x384xf32, #tpu.memory_space<vmem>>, vector<16x128xf32>,
    %c0_8 = arith.constant 0 : index
    %c0_9 = arith.constant 0 : index
    %15 = vector.load %arg9[%c0_8, %c0_9] : memref<16x384xf32, #tpu.memory_space<vmem>>, vector<1x128xf32>
    tpu.vector_store %arg9[%c0_8, %c0_9], %12 {strides = array<i32>} : memref<16x384xf32, #tpu.memory_space<vmem>>, vector<1x128xf32>,
    %16 = vector.extract_strided_slice %13 {offsets = [0, 0], sizes = [15, 128], strides = [1, 1]} : vector<16x128xf32> to vector<15x128xf32>
    %c1 = arith.constant 1 : index
    %c0_10 = arith.constant 0 : index
    %17 = vector.load %arg9[%c1, %c0_10] : memref<16x384xf32, #tpu.memory_space<vmem>>, vector<15x128xf32>
    tpu.vector_store %arg9[%c1, %c0_10], %16 {strides = array<i32>} : memref<16x384xf32, #tpu.memory_space<vmem>>, vector<15x128xf32>,
    %18 = vector.extract_strided_slice %13 {offsets = [1, 0], sizes = [15, 128], strides = [1, 1]} : vector<16x128xf32> to vector<15x128xf32>
    %c0_11 = arith.constant 0 : index
    %c256 = arith.constant 256 : index
    %19 = vector.load %arg9[%c0_11, %c256] : memref<16x384xf32, #tpu.memory_space<vmem>>, vector<15x128xf32>
    tpu.vector_store %arg9[%c0_11, %c256], %18 {strides = array<i32>} : memref<16x384xf32, #tpu.memory_space<vmem>>, vector<15x128xf32>,
    %c15 = arith.constant 15 : index
    %c256_12 = arith.constant 256 : index
    %20 = vector.load %arg9[%c15, %c256_12] : memref<16x384xf32, #tpu.memory_space<vmem>>, vector<1x128xf32>
    tpu.vector_store %arg9[%c15, %c256_12], %12 {strides = array<i32>} : memref<16x384xf32, #tpu.memory_space<vmem>>, vector<1x128xf32>,
    %c0_13 = arith.constant 0 : index
    %c0_14 = arith.constant 0 : index
    %21 = vector.load %arg9[%c0_13, %c0_14] : memref<16x384xf32, #tpu.memory_space<vmem>>, vector<16x384xf32>
    %22 = arith.truncf %21 : vector<16x384xf32> to vector<16x384xbf16>
    %c0_15 = arith.constant 0 : index
    %c0_16 = arith.constant 0 : index
    %23 = vector.load %arg2[%c0_15, %c0_16] : memref<384x128xbf16, #tpu.memory_space<vmem>>, vector<384x128xbf16>
    %cst_17 = arith.constant dense<0.000000e+00> : vector<16x128xf32>
    %24 = tpu.matmul %22, %23, %cst_17 {dimension_numbers = #tpu.dot_dimension_numbers<[1], [0], [0], [1], [0, 0, 1, 1], [], []>} : vector<16x384xbf16>, vector<384x128xbf16>, vector<16x128xf32> -> vector<16x128xf32>
    %c0_18 = arith.constant 0 : index
    %c0_19 = arith.constant 0 : index
    %25 = vector.load %arg3[%c0_18, %c0_19] : memref<1x128xf32, #tpu.memory_space<vmem>>, vector<1x128xf32>
    %26 = vector.broadcast %25 : vector<1x128xf32> to vector<16x128xf32>
    %27 = arith.addf %24, %26 : vector<16x128xf32>
    %28 = vector.shape_cast %27 : vector<16x128xf32> to vector<1x16x128xf32>
    %29 = arith.truncf %28 : vector<1x16x128xf32> to vector<1x16x128xbf16>
    %c0_20 = arith.constant 0 : index
    %c0_21 = arith.constant 0 : index
    %c0_22 = arith.constant 0 : index
    %30 = vector.load %arg6[%c0_20, %c0_21, %c0_22] : memref<1x16x128xbf16, #tpu.memory_space<vmem>>, vector<1x16x128xbf16>
    tpu.vector_store %arg6[%c0_20, %c0_21, %c0_22], %29 {strides = array<i32>} : memref<1x16x128xbf16, #tpu.memory_space<vmem>>, vector<1x16x128xbf16>,
    %cst_23 = arith.constant dense<0.000000e+00> : vector<128xf32>
    %31 = vector.multi_reduction <add>, %27, %cst_23 [0] : vector<16x128xf32> to vector<128xf32>
    %32 = vector.shape_cast %31 : vector<128xf32> to vector<1x128xf32>
    %c0_24 = arith.constant 0 : index
    %c0_25 = arith.constant 0 : index
    %c0_26 = arith.constant 0 : index
    %33 = vector.load %arg7[%c0_24, %c0_25, %c0_26] : memref<1x1x128xf32, #tpu.memory_space<vmem>>, vector<1x1x128xf32>
    %34 = vector.shape_cast %33 : vector<1x1x128xf32> to vector<1x128xf32>
    %35 = vector.shape_cast %32 : vector<1x128xf32> to vector<1x1x128xf32>
    tpu.vector_store %arg7[%c0_24, %c0_25, %c0_26], %35 {strides = array<i32>} : memref<1x1x128xf32, #tpu.memory_space<vmem>>, vector<1x1x128xf32>,
    %36 = arith.mulf %27, %27 : vector<16x128xf32>
    %cst_27 = arith.constant dense<0.000000e+00> : vector<128xf32>
    %37 = vector.multi_reduction <add>, %36, %cst_27 [0] : vector<16x128xf32> to vector<128xf32>
    %38 = vector.shape_cast %37 : vector<128xf32> to vector<1x128xf32>
    %c0_28 = arith.constant 0 : index
    %c0_29 = arith.constant 0 : index
    %c0_30 = arith.constant 0 : index
    %39 = vector.load %arg8[%c0_28, %c0_29, %c0_30] : memref<1x1x128xf32, #tpu.memory_space<vmem>>, vector<1x1x128xf32>
    %40 = vector.shape_cast %39 : vector<1x1x128xf32> to vector<1x128xf32>
    %41 = vector.shape_cast %38 : vector<1x128xf32> to vector<1x1x128xf32>
    tpu.vector_store %arg8[%c0_28, %c0_29, %c0_30], %41 {strides = array<i32>} : memref<1x1x128xf32, #tpu.memory_space<vmem>>, vector<1x1x128xf32>,
    return
  }
  func.func @transform_0(%arg0: i32) -> (i32, i32, i32) {
    %c0_i32 = arith.constant 0 : i32
    %c0_i32_0 = arith.constant 0 : i32
    %c0_i32_1 = arith.constant 0 : i32
    return %arg0, %c0_i32, %c0_i32_0 : i32, i32, i32
  }
  func.func @transform_1(%arg0: i32) -> (i32, i32) {
    %c0_i32 = arith.constant 0 : i32
    %c0_i32_0 = arith.constant 0 : i32
    %c0_i32_1 = arith.constant 0 : i32
    return %c0_i32, %c0_i32_0 : i32, i32
  }
  func.func @transform_2(%arg0: i32) -> (i32, i32) {
    %c0_i32 = arith.constant 0 : i32
    %c0_i32_0 = arith.constant 0 : i32
    %c0_i32_1 = arith.constant 0 : i32
    return %c0_i32, %c0_i32_0 : i32, i32
  }
  func.func @transform_3(%arg0: i32) -> (i32, i32) {
    %c0_i32 = arith.constant 0 : i32
    %c0_i32_0 = arith.constant 0 : i32
    %c0_i32_1 = arith.constant 0 : i32
    return %c0_i32, %c0_i32_0 : i32, i32
  }
  func.func @transform_4(%arg0: i32) -> (i32, i32) {
    %c0_i32 = arith.constant 0 : i32
    %c0_i32_0 = arith.constant 0 : i32
    %c0_i32_1 = arith.constant 0 : i32
    return %c0_i32, %c0_i32_0 : i32, i32
  }
  func.func @transform_5(%arg0: i32) -> (i32, i32, i32) {
    %c0_i32 = arith.constant 0 : i32
    %c0_i32_0 = arith.constant 0 : i32
    %c0_i32_1 = arith.constant 0 : i32
    return %arg0, %c0_i32, %c0_i32_0 : i32, i32, i32
  }
  func.func @transform_6(%arg0: i32) -> (i32, i32, i32) {
    %c0_i32 = arith.constant 0 : i32
    %c0_i32_0 = arith.constant 0 : i32
    %c0_i32_1 = arith.constant 0 : i32
    return %arg0, %c0_i32, %c0_i32_0 : i32, i32, i32
  }
  func.func @transform_7(%arg0: i32) -> (i32, i32, i32) {
    %c0_i32 = arith.constant 0 : i32
    %c0_i32_0 = arith.constant 0 : i32
    %c0_i32_1 = arith.constant 0 : i32
    return %arg0, %c0_i32, %c0_i32_0 : i32, i32, i32
  }
}

module attributes {stable_mosaic.version = 11 : i64} {
  func.func @_bn_relu_kernel(%arg0: i32, %arg1: memref<32x128xbf16, #tpu.memory_space<vmem>>, %arg2: memref<1x128xf32, #tpu.memory_space<vmem>>, %arg3: memref<1x128xf32, #tpu.memory_space<vmem>>, %arg4: memref<32x128xf32, #tpu.memory_space<vmem>>) attributes {dimension_semantics = [#tpu.dimension_semantics<parallel>], iteration_bounds = array<i64: 1>, scalar_prefetch = 0 : i64, scratch_operands = 0 : i64, tpu.core_type = #tpu.core_type<tc>, window_params = [{transform_indices = @transform_0, window_bounds = array<i64: 32, 128>}, {pipeline_mode = #tpu.pipeline_mode<synchronous>, transform_indices = @transform_1, window_bounds = array<i64: 1, 128>}, {pipeline_mode = #tpu.pipeline_mode<synchronous>, transform_indices = @transform_2, window_bounds = array<i64: 1, 128>}, {transform_indices = @transform_3, window_bounds = array<i64: 32, 128>}]} {
    %c0 = arith.constant 0 : index
    %c0_0 = arith.constant 0 : index
    %0 = vector.load %arg1[%c0, %c0_0] : memref<32x128xbf16, #tpu.memory_space<vmem>>, vector<32x128xbf16>
    %1 = arith.extf %0 : vector<32x128xbf16> to vector<32x128xf32>
    %c0_1 = arith.constant 0 : index
    %c0_2 = arith.constant 0 : index
    %2 = vector.load %arg2[%c0_1, %c0_2] : memref<1x128xf32, #tpu.memory_space<vmem>>, vector<1x128xf32>
    %3 = vector.broadcast %2 : vector<1x128xf32> to vector<32x128xf32>
    %4 = arith.mulf %1, %3 : vector<32x128xf32>
    %c0_3 = arith.constant 0 : index
    %c0_4 = arith.constant 0 : index
    %5 = vector.load %arg3[%c0_3, %c0_4] : memref<1x128xf32, #tpu.memory_space<vmem>>, vector<1x128xf32>
    %6 = vector.broadcast %5 : vector<1x128xf32> to vector<32x128xf32>
    %7 = arith.addf %4, %6 : vector<32x128xf32>
    %cst = arith.constant 0.000000e+00 : f32
    %8 = vector.broadcast %cst : f32 to vector<32x128xf32>
    %9 = arith.maximumf %7, %8 : vector<32x128xf32>
    %c0_5 = arith.constant 0 : index
    %c0_6 = arith.constant 0 : index
    %10 = vector.load %arg4[%c0_5, %c0_6] : memref<32x128xf32, #tpu.memory_space<vmem>>, vector<32x128xf32>
    tpu.vector_store %arg4[%c0_5, %c0_6], %9 {strides = array<i32>} : memref<32x128xf32, #tpu.memory_space<vmem>>, vector<32x128xf32>,
    return
  }
  func.func @transform_0(%arg0: i32) -> (i32, i32) {
    %c0_i32 = arith.constant 0 : i32
    %c0_i32_0 = arith.constant 0 : i32
    return %arg0, %c0_i32 : i32, i32
  }
  func.func @transform_1(%arg0: i32) -> (i32, i32) {
    %c0_i32 = arith.constant 0 : i32
    %c0_i32_0 = arith.constant 0 : i32
    %c0_i32_1 = arith.constant 0 : i32
    return %c0_i32, %c0_i32_0 : i32, i32
  }
  func.func @transform_2(%arg0: i32) -> (i32, i32) {
    %c0_i32 = arith.constant 0 : i32
    %c0_i32_0 = arith.constant 0 : i32
    %c0_i32_1 = arith.constant 0 : i32
    return %c0_i32, %c0_i32_0 : i32, i32
  }
  func.func @transform_3(%arg0: i32) -> (i32, i32) {
    %c0_i32 = arith.constant 0 : i32
    %c0_i32_0 = arith.constant 0 : i32
    return %arg0, %c0_i32 : i32, i32
  }
}

</mosaic_0001>

<bundles_post_ra>
// kernel: tile.33
= control target key start
LH: loop header
LB: loop body
LE: loop exit
PB: predicated region body
PF: predicated region fallthrough
CT: control target
= control target key end

     0   :  { %s28_s0 = inlined_call_operand.vmem [shape: f32[8], index: 0, kind: input, shape index: {}]   ;;  %s29_s1 = inlined_call_operand.vmem [shape: f32[16,8], index: 1, kind: output, shape index: {}]  }
   0x1   :  { %v4_v0 = vld [vmem:[%s28_s0] ss:$0 sm:$0xff] }
   0x2   :  { %5 = vst [vmem:[%s29_s1] sm:$0xff] %v4_v0  ;;  %8 = vst [vmem:[%s29_s1 + $0x8] sm:$0xff] %v4_v0 }

// kernel: tile.34
= control target key start
LH: loop header
LB: loop body
LE: loop exit
PB: predicated region body
PF: predicated region fallthrough
CT: control target
= control target key end

     0   :  { %s131_s10 = smov 120   ;;  %s132_s11 = smov 104   ;;  %vm3_vm0 = vcmask 64512   ;;  %vm9_vm1 = vcmask 1048512   ;;  %vm15_vm2 = vcmask 982912   ;;  %vm21_vm3 = vcmask 917312   ;;  %s207_s0 = inlined_call_operand.vmem [shape: f32[16,8], index: 0, kind: input, shape index: {}]   ;;  %s208_s1 = inlined_call_operand.vmem [shape: f32[1,128], index: 1, kind: output, shape index: {}]  }
   0x1   :  { %v101_v0 = vld [vmem:[%s207_s0 + $0xf] sm:$0x1]   ;;  %v103_v1 = vld [vmem:[%s207_s0 + $0xd] sm:$0x1]   ;;  %v102_v2 = vld [vmem:[%s207_s0 + $0xe] sm:$0x1]  }
   0x2   :  { %7 = vrot.lane.b32.xlu0 %v101_v0, %s131_s10  ;;  %19 = vrot.lane.b32.xlu1 %v103_v1, %s132_s11  ;;  %v104_v3 = vld [vmem:[%s207_s0 + $0xc] sm:$0x1]   ;;  %s133_s16 = smov 112   ;;  %s134_s17 = smov 96   ;;  %v105_v4 = vld [vmem:[%s207_s0 + $0xb] sm:$0x1]  }
   0x3   :  { %v106_v5 = vld [vmem:[%s207_s0 + $0xa] sm:$0x1]   ;;  %v2_v6 = vld [vmem:[%s207_s0] sm:$0x1]   ;;  %s135_s24 = smov 88   ;;  %s136_s25 = smov 80  }
   0x4   :  { %4 = vst.msk [vmem:[#allocation0] sm:$0x1] %vm3_vm0, %v2_v6   ;;  %v107_v7 = vld [vmem:[%s207_s0 + $0x9] sm:$0x1]   ;;  %v108_v8 = vld [vmem:[%s207_s0 + $0x8] sm:$0x1]  }
   0x5   :  { %s137_s30 = smov 72   ;;  %s138_s2 = smov 64   ;;  %v109_v9 = vld [vmem:[%s207_s0 + $0x7] sm:$0x1]   ;;  %v110_v10 = vld [vmem:[%s207_s0 + $0x6] sm:$0x1]  }
   0x6   :  { %13 = vrot.lane.b32.xlu0 %v102_v2, %s133_s16  ;;  %25 = vrot.lane.b32.xlu1 %v104_v3, %s134_s17  ;;  %s139_s7 = smov 56   ;;  %s140_s8 = smov 48   ;;  %v111_v11 = vld [vmem:[%s207_s0 + $0x5] sm:$0x1]   ;;  %v112_v12 = vld [vmem:[%s207_s0 + $0x4] sm:$0x1]  }
   0x7   :  { %s141_s13 = smov 40   ;;  %s142_s14 = smov 32   ;;  %v113_v13 = vld [vmem:[%s207_s0 + $0x3] sm:$0x1]   ;;  %v114_v14 = vld [vmem:[%s207_s0 + $0x2] sm:$0x1]  }
   0x8   :  { %s143_s19 = smov 24   ;;  %s144_s20 = smov 16   ;;  %v115_v15 = vld [vmem:[%s207_s0 + $0x1] sm:$0x1]   ;;  %vm27_vm4 = vcmask 851712   ;;  %vm33_vm5 = vcmask 786112  }
   0x9   :  { %s145_s0 = smov 8   ;;  %vm39_vm6 = vcmask 720512   ;;  %vm45_vm7 = vcmask 654912   ;;  %vm51_vm8 = vcmask 589312   ;;  %vm57_vm9 = vcmask 523712  }
   0xa   :  { %31 = vrot.lane.b32.xlu0 %v105_v4, %s135_s24  ;;  %37 = vrot.lane.b32.xlu1 %v106_v5, %s136_s25  ;;  %vm63_vm10 = vcmask 458112   ;;  %vm69_vm11 = vcmask 392512   ;;  %vm75_vm12 = vcmask 326912   ;;  %vm81_vm13 = vcmask 261312  }
   0xb   :  { %vm87_vm14 = vcmask 195712   ;;  %vm93_vm15 = vcmask 130112  }
   0xe   :  { %43 = vrot.lane.b32.xlu0 %v107_v7, %s137_s30  ;;  %49 = vrot.lane.b32.xlu1 %v108_v8, %s138_s2 }
  0x12   :  { %55 = vrot.lane.b32.xlu0 %v109_v9, %s139_s7  ;;  %61 = vrot.lane.b32.xlu1 %v110_v10, %s140_s8 }
  0x16   :  { %67 = vrot.lane.b32.xlu0 %v111_v11, %s141_s13  ;;  %73 = vrot.lane.b32.xlu1 %v112_v12, %s142_s14 }
  0x1a   :  { %79 = vrot.lane.b32.xlu0 %v113_v13, %s143_s19  ;;  %85 = vrot.lane.b32.xlu1 %v114_v14, %s144_s20 }
  0x1e   :  { %91 = vrot.lane.b32.xlu0 %v115_v15, %s145_s0 }
  0x74   :  { %v8_v16 = vpop.permute.xlu0 %7   ;;  %v20_v17 = vpop.permute.xlu1 %19  }
  0x75   :  { %10 = vst.msk [vmem:[#allocation0] sm:$0x1] %vm9_vm1, %v8_v16  }
  0x78   :  { %v14_v18 = vpop.permute.xlu0 %13   ;;  %v26_v19 = vpop.permute.xlu1 %25  }
  0x79   :  { %16 = vst.msk [vmem:[#allocation0] sm:$0x1] %vm15_vm2, %v14_v18  }
  0x7a   :  { %22 = vst.msk [vmem:[#allocation0] sm:$0x1] %vm21_vm3, %v20_v17  }
  0x7b   :  { %28 = vst.msk [vmem:[#allocation0] sm:$0x1] %vm27_vm4, %v26_v19  }
  0x7c   :  { %v32_v20 = vpop.permute.xlu0 %31   ;;  %v38_v21 = vpop.permute.xlu1 %37  }
  0x7d   :  { %34 = vst.msk [vmem:[#allocation0] sm:$0x1] %vm33_vm5, %v32_v20  }
  0x7e   :  { %40 = vst.msk [vmem:[#allocation0] sm:$0x1] %vm39_vm6, %v38_v21  }
  0x80   :  { %v44_v22 = vpop.permute.xlu0 %43   ;;  %v50_v23 = vpop.permute.xlu1 %49  }
  0x81   :  { %46 = vst.msk [vmem:[#allocation0] sm:$0x1] %vm45_vm7, %v44_v22  }
  0x82   :  { %52 = vst.msk [vmem:[#allocation0] sm:$0x1] %vm51_vm8, %v50_v23  }
  0x84   :  { %v56_v24 = vpop.permute.xlu0 %55   ;;  %v62_v25 = vpop.permute.xlu1 %61  }
  0x85   :  { %58 = vst.msk [vmem:[#allocation0] sm:$0x1] %vm57_vm9, %v56_v24  }
  0x86   :  { %64 = vst.msk [vmem:[#allocation0] sm:$0x1] %vm63_vm10, %v62_v25  }
  0x88   :  { %v68_v26 = vpop.permute.xlu0 %67   ;;  %v74_v27 = vpop.permute.xlu1 %73  }
  0x89   :  { %70 = vst.msk [vmem:[#allocation0] sm:$0x1] %vm69_vm11, %v68_v26  }
  0x8a   :  { %76 = vst.msk [vmem:[#allocation0] sm:$0x1] %vm75_vm12, %v74_v27  }
  0x8c   :  { %v80_v28 = vpop.permute.xlu0 %79   ;;  %v86_v29 = vpop.permute.xlu1 %85  }
  0x8d   :  { %82 = vst.msk [vmem:[#allocation0] sm:$0x1] %vm81_vm13, %v80_v28  }
  0x8e   :  { %88 = vst.msk [vmem:[#allocation0] sm:$0x1] %vm87_vm14, %v86_v29  }
  0x90   :  { %v92_v30 = vpop.permute.xlu0 %91  }
  0x91   :  { %94 = vst.msk [vmem:[#allocation0] sm:$0x1] %vm93_vm15, %v92_v30  }
  0x98   :  { %v98_v31 = vld [vmem:[#allocation0] sm:$0x1] }
  0x99   :  { %100 = vst [vmem:[%s208_s1] sm:$0x1] %v98_v31 }

// kernel: double_conv_forward.3
= control target key start
LH: loop header
LB: loop body
LE: loop exit
PB: predicated region body
PF: predicated region fallthrough
CT: control target
= control target key end

     0   :  { %s739_s24 = smov 0   ;;  %s815_s0 = inlined_call_operand.vmem [shape: bf16[2,16,64], index: 0, kind: input, shape index: {}]   ;;  %s816_s1 = inlined_call_operand.vmem [shape: bf16[192,128], index: 1, kind: input, shape index: {}]   ;;  %s817_s2 = inlined_call_operand.vmem [shape: f32[1,128], index: 2, kind: input, shape index: {}]   ;;  %s818_s3 = inlined_call_operand.vmem [shape: f32[1,64], index: 3, kind: input, shape index: {}]   ;;  %s819_s4 = inlined_call_operand.vmem [shape: f32[1,64], index: 4, kind: input, shape index: {}]   ;;  %s820_s5 = inlined_call_operand.vmem [shape: bf16[2,16,128], index: 5, kind: output, shape index: {0}]   ;;  %s821_s6 = inlined_call_operand.vmem [shape: f32[2,1,128], index: 6, kind: output, shape index: {1}]   ;;  %s822_s7 = inlined_call_operand.vmem [shape: f32[2,1,128], index: 7, kind: output, shape index: {2}]  }
   0x1 LB: > { %s620_s3 = sadd.s32 4294967295, %s694_s24   ;;  %p624_p0 = scmp.ge.s32.totalorder %s694_s24, 1  ;;  %s694_s24 = sphi %s739_s24, %s18_s24  }
   0x2   : > { %p242_p1 = scmp.lt.s32.totalorder %s694_s24, 3 }
   0x4   : > { %p243_p2 = pnand %p624_p0, %p242_p1 }
   0x5   : > { %p280_p3 = scmp.lt.s32.totalorder (!%p243_p2), %s620_s3, 1  ;;  %v676_v0 = vld [vmem:[%s816_s1] sm:$0xff] (!%p243_p2)   ;;  %v696_v1 = vmov (!%p243_p2), 0   ;;  %v677_v2 = vld [vmem:[%s816_s1 + $0x8] sm:$0xff] (!%p243_p2)   ;;  %vm312_vm0 = vcmask (!%p243_p2), 516096   ;;  %v678_v4 = vld [vmem:[%s816_s1 + $0x10] sm:$0xff] (!%p243_p2)  }
   0x6   : > { %246 = sbr.rel (%p243_p2) target bundleno = 384 (0x180), region = 40  ;;  %446 = vmatprep.subr.bf16.mxu0 (!%p243_p2), %v696_v1  ;;  %v697_v7 = vmov (!%p243_p2), 0.0   ;;  %vm314_vm1 = vcmask (!%p243_p2), 1040384   ;;  %v679_v10 = vld [vmem:[%s816_s1 + $0x18] sm:$0xff] (!%p243_p2)   ;;  %s698_s13 = smov (!%p243_p2), 64   ;;  %vm324_vm2 = vcmask (!%p243_p2), 1046528  }
   0x7   : > { %447 = vmatpush1.bf16.msra.mxu0 (!%p243_p2), %v676_v0  ;;  %333 = vst.msk [vmem:[#allocation2 + $0x1f] sm:$0x1] (!%p243_p2), %vm312_vm0, %v697_v7  ;;  %vm322_vm3 = vcmask (!%p243_p2), 523264   ;;  %vm331_vm4 = vcmask (!%p243_p2), 522240   ;;  %v680_v15 = vld [vmem:[%s816_s1 + $0x20] sm:$0xff] (!%p243_p2)   ;;  %v681_v17 = vld [vmem:[%s816_s1 + $0x28] sm:$0xff] (!%p243_p2)  }
   0x8   : > { %448 = vmatprep.subr.bf16.mxu0 (!%p243_p2), %v696_v1  ;;  %v682_v19 = vld [vmem:[%s816_s1 + $0x30] sm:$0xff] (!%p243_p2)   ;;  %v683_v22 = vld [vmem:[%s816_s1 + $0x38] sm:$0xff] (!%p243_p2)   ;;  %v684_v23 = vld [vmem:[%s816_s1 + $0x40] sm:$0xff] (!%p243_p2)   ;;  %vm309_vm5 = vcmask (!%p243_p2), 1048064   ;;  %vm320_vm6 = vcmask (!%p243_p2), 523265  }
   0x9   : > { %v685_v24 = vld [vmem:[%s816_s1 + $0x48] sm:$0xff] (!%p243_p2)   ;;  %v686_v25 = vld [vmem:[%s816_s1 + $0x50] sm:$0xff] (!%p243_p2)   ;;  %v687_v26 = vld [vmem:[%s816_s1 + $0x58] sm:$0xff] (!%p243_p2)  }
   0xa   : > { %v629_v33 = vld [vmem:[%s817_s2] ss:$0 sm:$0xff] (!%p243_p2) }
   0xb   : > { %449 = vmatpush1.bf16.msra.mxu0 (!%p243_p2), %v677_v2 }
   0xc   : > { %450 = vmatprep.subr.bf16.mxu0 (!%p243_p2), %v696_v1 }
   0xd   : > { %s824_s3 = smov (!%p280_p3, %s620_s3), 1 }
   0xe   : > { %s647_s28 = sshll.u32 %s824_s3, 3  ;;  %s295_s17 = scalar_lea.vmem %s822_s7, %s824_s3 }
   0xf   : > { %s284_s8 = scalar_lea.vmem %s815_s0, %s647_s28  ;;  %451 = vmatpush1.bf16.msra.mxu0 %v678_v4  ;;  %s289_s12 = scalar_lea.vmem %s820_s5, %s647_s28 }
  0x10   : > { %v652_v3 = vld [vmem:[%s284_s8] sm:$0xff]   ;;  %452 = vmatprep.subr.bf16.mxu0 %v696_v1  ;;  %s292_s28 = scalar_lea.vmem %s821_s6, %s824_s3 }
  0x11   : > { %v653_v5 = vunpack.c.l.bf16 %v652_v3  ;;  %v654_v6 = vunpack.c.h.bf16 %v652_v3 }
  0x13   : > { %v316_v8 = vrot.slane %v654_v6, 7  ;;  %v671_v9 = vpack.i.bf16 %v654_v6, %v653_v5  ;;  %v315_v11 = vrot.slane %v653_v5, 7  ;;  %v325_v13 = vrot.slane %v653_v5, 1  ;;  %453 = vmatpush1.bf16.msra.mxu0 %v679_v10 }
  0x14   : > { %v326_v14 = vrot.slane %v654_v6, 1  ;;  %454 = vmatprep.subr.bf16.mxu0 %v696_v1 }
  0x15   : > { %672 = vrot.lane.b32.xlu0 %v671_v9, %s698_s13  ;;  %v317_v12 = vsel %vm314_vm1, %v315_v11, %v316_v8 }
  0x16   : > { %v327_v16 = vsel %vm324_vm2, %v325_v13, %v326_v14  ;;  %332 = vst.msk [vmem:[#allocation2 + $0x18] sm:$0x7f] %vm331_vm4, %v326_v14 }
  0x17   : > { %330 = vst.msk [vmem:[#allocation2 + $0x8] sm:$0xff] %vm322_vm3, %v327_v16  ;;  %455 = vmatpush1.bf16.msra.mxu0 %v680_v15 }
  0x18   : > { %456 = vmatprep.subr.bf16.mxu0 %v696_v1 }
  0x1b   : > { %457 = vmatpush1.bf16.msra.mxu0 %v681_v17 }
  0x1c   : > { %458 = vmatprep.subr.bf16.mxu0 %v696_v1 }
  0x1d   : > { %v337_v18 = vld [vmem:[#allocation2 + $0x18] sm:$0xff] }
  0x1e   : > { %v335_v20 = vld [vmem:[#allocation2 + $0x8] sm:$0xff] }
  0x1f   : > { %v339_v21 = vpack.c.bf16 %v337_v18, %v335_v20  ;;  %459 = vmatpush1.bf16.msra.mxu0 %v682_v19 }
  0x20   : > { %460 = vmatprep.subr.bf16.mxu0 %v696_v1 }
  0x21   : > { %642 = vmatprep.mubr.msk.bf16.mxu0 %vm322_vm3, %v339_v21 }
  0x23   : > { %461 = vmatpush1.bf16.msra.mxu0 %v683_v22 }
  0x24   : > { %462 = vmatprep.subr.bf16.mxu0 %v696_v1 }
  0x27   : > { %463 = vmatpush1.bf16.msra.mxu0 %v684_v23 }
  0x28   : > { %464 = vmatprep.subr.bf16.mxu0 %v696_v1 }
  0x2b   : > { %465 = vmatpush1.bf16.msra.mxu0 %v685_v24 }
  0x2c   : > { %466 = vmatprep.subr.bf16.mxu0 %v696_v1 }
  0x2f   : > { %467 = vmatpush1.bf16.msra.mxu0 %v686_v25 }
  0x30   : > { %468 = vmatprep.subr.bf16.mxu0 %v696_v1 }
  0x33   : > { %469 = vmatpush1.bf16.msra.mxu0 %v687_v26 }
  0x87   : > { %v673_v27 = vpop.permute.xlu0 %672 }
  0x88   : > { %v675_v28 = vunpack.i.h.bf16 %v673_v27  ;;  %v674_v29 = vunpack.i.l.bf16 %v673_v27 }
  0x8a   : > { %311 = vst.msk [vmem:[#allocation2 + $0x10] sm:$0xff] %vm309_vm5, %v675_v28  ;;  %310 = vst.msk [vmem:[#allocation2] sm:$0xff] %vm309_vm5, %v674_v29 }
  0x8b   : > { %313 = vst.msk [vmem:[#allocation2] sm:$0x1] %vm312_vm0, %v697_v7 }
  0x8c   : > { %321 = vst.msk [vmem:[#allocation2] sm:$0xfe] %vm320_vm6, %v315_v11 }
  0x8d   : > { %323 = vst.msk [vmem:[#allocation2 + $0x10] sm:$0xff] %vm322_vm3, %v317_v12 }
  0x93   : > { %v334_v30 = vld [vmem:[#allocation2] sm:$0xff] }
  0x94   : > { %v336_v31 = vld [vmem:[#allocation2 + $0x10] sm:$0xff] }
  0x95   : > { %v338_v32 = vpack.c.bf16 %v336_v31, %v334_v30 }
  0x97   : > { %479 = vmatmul.mubr.bf16.vlgmr.msra.gmra.mrb[0].mxu0 %v338_v32 }
 0x16a   : > { %v480_v34 = vpop.f32.mrb[0].mxu0 }
 0x16b   : > { %v481_v35 = vadd.f32 %v629_v33, %v480_v34  ;;  %v482_v36 = vpop.f32.mrb[1].mxu0 }
 0x16c   : > { %v483_v37 = vpop.f32.mrb[2].mxu0 }
 0x16d   : > { %v484_v38 = vadd.f32 %v629_v33, %v483_v37  ;;  %v485_v39 = vpop.f32.mrb[3].mxu0  ;;  %v505_v40 = vmul.f32 %v481_v35, %v481_v35 }
 0x16f   : > { %v658_v41 = vpack.c.bf16 %v484_v38, %v481_v35  ;;  %v497_v42 = vadd.f32 %v484_v38, %v481_v35  ;;  %v506_v43 = vmul.f32 %v484_v38, %v484_v38 }
 0x171   : > { %659 = vst [vmem:[%s289_s12] sm:$0xff] %v658_v41   ;;  %v498_v44 = vrot.slane %v497_v42, 4  ;;  %v507_v45 = vadd.f32 %v506_v43, %v505_v40 }
 0x173   : > { %v499_v46 = vadd.f32 %v498_v44, %v497_v42  ;;  %v508_v47 = vrot.slane %v507_v45, 4 }
 0x175   : > { %v500_v48 = vrot.slane %v499_v46, 2  ;;  %v509_v49 = vadd.f32 %v508_v47, %v507_v45 }
 0x177   : > { %v501_v50 = vadd.f32 %v500_v48, %v499_v46  ;;  %v510_v51 = vrot.slane %v509_v49, 2 }
 0x179   : > { %v502_v52 = vrot.slane %v501_v50, 1  ;;  %v511_v53 = vadd.f32 %v510_v51, %v509_v49 }
 0x17b   : > { %v503_v54 = vadd.f32 %v502_v52, %v501_v50  ;;  %v512_v55 = vrot.slane %v511_v53, 1 }
 0x17d   : > { %504 = vst [vmem:[%s292_s28] sm:$0x1] %v503_v54  ;;  %v513_v56 = vadd.f32 %v512_v55, %v511_v53 }
 0x17f   : > { %514 = vst [vmem:[%s295_s17] sm:$0x1] %v513_v56 }
 0x180 PF: > { %s18_s24 = sadd.s32 1, %s694_s24  }
 0x181   : > { %p15_p4 = scmp.ge.s32.totalorder %s18_s24, 4  }
 0x183   :  { %17 = sbr.rel (!%p15_p4) target bundleno = 1 (0x1), region = 94 }

// kernel: double_conv_forward.4
= control target key start
LH: loop header
LB: loop body
LE: loop exit
PB: predicated region body
PF: predicated region fallthrough
CT: control target
= control target key end

     0   :  { %s954_s24 = smov 0   ;;  %s1082_s0 = inlined_call_operand.vmem [shape: bf16[2,16,128], index: 0, kind: input, shape index: {}]   ;;  %s1083_s1 = inlined_call_operand.vmem [shape: bf16[384,128], index: 1, kind: input, shape index: {}]   ;;  %s1084_s2 = inlined_call_operand.vmem [shape: f32[1,128], index: 2, kind: input, shape index: {}]   ;;  %s1085_s3 = inlined_call_operand.vmem [shape: f32[1,128], index: 3, kind: input, shape index: {}]   ;;  %s1086_s4 = inlined_call_operand.vmem [shape: f32[1,128], index: 4, kind: input, shape index: {}]   ;;  %s1087_s5 = inlined_call_operand.vmem [shape: bf16[2,16,128], index: 5, kind: output, shape index: {0}]   ;;  %s1088_s6 = inlined_call_operand.vmem [shape: f32[2,1,128], index: 6, kind: output, shape index: {1}]   ;;  %s1089_s7 = inlined_call_operand.vmem [shape: f32[2,1,128], index: 7, kind: output, shape index: {2}]  }
   0x1 LB: > { %s766_s25 = sadd.s32 4294967295, %s910_s24   ;;  %p770_p0 = scmp.ge.s32.totalorder %s910_s24, 1  ;;  %s910_s24 = sphi %s954_s24, %s18_s24  }
   0x2   : > { %p242_p1 = scmp.lt.s32.totalorder %s910_s24, 3 }
   0x4   : > { %p243_p2 = pnand %p770_p0, %p242_p1 }
   0x5   : > { %v880_v0 = vld [vmem:[%s1083_s1 + $0x40] sm:$0xff] (!%p243_p2)   ;;  %v912_v2 = vmov (!%p243_p2), 0.0   ;;  %v883_v4 = vld [vmem:[%s1083_s1 + $0x48] sm:$0xff] (!%p243_p2)   ;;  %v886_v7 = vld [vmem:[%s1083_s1 + $0x50] sm:$0xff] (!%p243_p2)   ;;  %vm913_vm0 = vmmov (!%p243_p2), 0   ;;  %p280_p3 = scmp.lt.s32.totalorder (!%p243_p2), %s766_s25, 1 }
   0x6   : > { %246 = sbr.rel (%p243_p2) target bundleno = 276 (0x114), region = 40  ;;  %v881_v1 = vld [vmem:[%s1083_s1] sm:$0xff] (!%p243_p2)   ;;  %850 = vmatprep.subr.bf16.mxu1 (!%p243_p2), %v912_v2  ;;  %323 = vst [vmem:[#allocation2] sm:$0x1] (!%p243_p2), %v912_v2  ;;  %342 = vst [vmem:[#allocation2 + $0x2f] sm:$0x1] (!%p243_p2), %v912_v2  ;;  %819 = vmatprep.subr.bf16.mxu0 (!%p243_p2), %v880_v0 }
   0x7   : > { %v882_v3 = vld [vmem:[%s1083_s1 + $0x80] sm:$0xff] (!%p243_p2)   ;;  %820 = vmatpush3.bf16.msra.mxu0 (!%p243_p2), %v881_v1  ;;  %v884_v5 = vld [vmem:[%s1083_s1 + $0x8] sm:$0xff] (!%p243_p2)   ;;  %866 = vmatprep.mubr.msk.bf16.mxu1 (!%p243_p2), %vm913_vm0, %v912_v2  ;;  %v887_v8 = vld [vmem:[%s1083_s1 + $0x10] sm:$0xff] (!%p243_p2)   ;;  %vm326_vm1 = vcmask (!%p243_p2), 1040384   ;;  %vm334_vm2 = vcmask (!%p243_p2), 1046528  }
   0x8   : > { %851 = vmatpush3.bf16.msra.mxu1 (!%p243_p2), %v882_v3  ;;  %821 = vmatprep.subr.bf16.mxu0 (!%p243_p2), %v883_v4  ;;  %v885_v6 = vld [vmem:[%s1083_s1 + $0x88] sm:$0xff] (!%p243_p2)   ;;  %v888_v9 = vld [vmem:[%s1083_s1 + $0x90] sm:$0xff] (!%p243_p2)   ;;  %v889_v10 = vld [vmem:[%s1083_s1 + $0x58] sm:$0xff] (!%p243_p2)  }
   0x9   : > { %852 = vmatprep.subr.bf16.mxu1 (!%p243_p2), %v912_v2  ;;  %v890_v11 = vld [vmem:[%s1083_s1 + $0x18] sm:$0xff] (!%p243_p2)   ;;  %v892_v13 = vld [vmem:[%s1083_s1 + $0x60] sm:$0xff] (!%p243_p2)   ;;  %v895_v16 = vld [vmem:[%s1083_s1 + $0x68] sm:$0xff] (!%p243_p2)  }
   0xa   : > { %v891_v12 = vld [vmem:[%s1083_s1 + $0x98] sm:$0xff] (!%p243_p2)   ;;  %v893_v14 = vld [vmem:[%s1083_s1 + $0x20] sm:$0xff] (!%p243_p2)   ;;  %v896_v17 = vld [vmem:[%s1083_s1 + $0x28] sm:$0xff] (!%p243_p2)  }
   0xb   : > { %822 = vmatpush3.bf16.msra.mxu0 (!%p243_p2), %v884_v5  ;;  %v894_v15 = vld [vmem:[%s1083_s1 + $0xa0] sm:$0xff] (!%p243_p2)   ;;  %v897_v18 = vld [vmem:[%s1083_s1 + $0xa8] sm:$0xff] (!%p243_p2)   ;;  %v898_v19 = vld [vmem:[%s1083_s1 + $0x70] sm:$0xff] (!%p243_p2)  }
   0xc   : > { %853 = vmatpush3.bf16.msra.mxu1 (!%p243_p2), %v885_v6  ;;  %823 = vmatprep.subr.bf16.mxu0 (!%p243_p2), %v886_v7  ;;  %v899_v20 = vld [vmem:[%s1083_s1 + $0x30] sm:$0xff] (!%p243_p2)   ;;  %v775_v23 = vld [vmem:[%s1085_s3] ss:$0 sm:$0xff] (!%p243_p2)  ;;  %v901_v24 = vld [vmem:[%s1083_s1 + $0x78] sm:$0xff] (!%p243_p2)  }
   0xd   : > { %854 = vmatprep.subr.bf16.mxu1 %v912_v2  ;;  %s1091_s25 = smov (!%p280_p3, %s766_s25), 1  ;;  %v900_v21 = vld [vmem:[%s1083_s1 + $0xb0] sm:$0xff]   ;;  %v776_v27 = vld [vmem:[%s1086_s4] ss:$0 sm:$0xff]  ;;  %v902_v30 = vld [vmem:[%s1083_s1 + $0x38] sm:$0xff]  }
   0xe   : > { %s806_s14 = sshll.u32 %s1091_s25, 3  ;;  %v903_v33 = vld [vmem:[%s1083_s1 + $0xb8] sm:$0xff]   ;;  %v777_v49 = vld [vmem:[%s1084_s2] ss:$0 sm:$0xff]  ;;  %s295_s29 = scalar_lea.vmem %s1089_s7, %s1091_s25 }
   0xf   : > { %824 = vmatpush3.bf16.msra.mxu0 %v887_v8  ;;  %s284_s23 = scalar_lea.vmem %s1082_s0, %s806_s14  ;;  %s289_s22 = scalar_lea.vmem %s1087_s5, %s806_s14 }
  0x10   : > { %855 = vmatpush3.bf16.msra.mxu1 %v888_v9  ;;  %825 = vmatprep.subr.bf16.mxu0 %v889_v10  ;;  %v811_v22 = vld [vmem:[%s284_s23] sm:$0xff]   ;;  %s292_s14 = scalar_lea.vmem %s1088_s6, %s1091_s25 }
  0x11   : > { %856 = vmatprep.subr.bf16.mxu1 %v912_v2  ;;  %v812_v25 = vunpack.c.l.bf16 %v811_v22  ;;  %v813_v26 = vunpack.c.h.bf16 %v811_v22 }
  0x13   : > { %826 = vmatpush3.bf16.msra.mxu0 %v890_v11  ;;  %v308_v28 = vmul.f32 %v812_v25, %v775_v23  ;;  %v309_v29 = vmul.f32 %v813_v26, %v775_v23 }
  0x14   : > { %857 = vmatpush3.bf16.msra.mxu1 %v891_v12  ;;  %827 = vmatprep.subr.bf16.mxu0 %v892_v13 }
  0x15   : > { %858 = vmatprep.subr.bf16.mxu1 %v912_v2  ;;  %v317_v31 = vadd.f32 %v776_v27, %v308_v28  ;;  %v318_v32 = vadd.f32 %v776_v27, %v309_v29 }
  0x17   : > { %828 = vmatpush3.bf16.msra.mxu0 %v893_v14  ;;  %v319_v34 = vmax.f32 %v317_v31, 0.0  ;;  %v320_v35 = vmax.f32 %v318_v32, 0.0 }
  0x18   : > { %859 = vmatpush3.bf16.msra.mxu1 %v894_v15  ;;  %829 = vmatprep.subr.bf16.mxu0 %v895_v16 }
  0x19   : > { %860 = vmatprep.subr.bf16.mxu1 %v912_v2  ;;  %v350_v36 = vpack.c.bf16 %v320_v35, %v319_v34  ;;  %v327_v37 = vrot.slane %v319_v34, 7  ;;  %v328_v38 = vrot.slane %v320_v35, 7  ;;  %v335_v39 = vrot.slane %v319_v34, 1 }
  0x1a   : > { %v336_v40 = vrot.slane %v320_v35, 1 }
  0x1b   : > { %830 = vmatpush3.bf16.msra.mxu0 %v896_v17  ;;  %583 = vmatprep.mubr.bf16.mxu0 %v350_v36  ;;  %v329_v41 = vsel %vm326_vm1, %v327_v37, %v328_v38  ;;  %332 = vst [vmem:[#allocation2] sm:$0xfe] %v327_v37 }
  0x1c   : > { %861 = vmatpush3.bf16.msra.mxu1 %v897_v18  ;;  %831 = vmatprep.subr.bf16.mxu0 %v898_v19  ;;  %v337_v42 = vsel %vm334_vm2, %v335_v39, %v336_v40  ;;  %341 = vst [vmem:[#allocation2 + $0x28] sm:$0x7f] %v336_v40 }
  0x1d   : > { %862 = vmatprep.subr.bf16.mxu1 %v912_v2 }
  0x1f   : > { %832 = vmatpush3.bf16.msra.mxu0 %v899_v20 }
  0x20   : > { %863 = vmatpush3.bf16.msra.mxu1 %v900_v21  ;;  %833 = vmatprep.subr.bf16.mxu0 %v901_v24 }
  0x21   : > { %864 = vmatprep.subr.bf16.mxu1 %v912_v2 }
  0x22   : > { %v343_v43 = vld [vmem:[#allocation2] sm:$0xff] }
  0x23   : > { %834 = vmatpush3.bf16.msra.mxu0 %v902_v30  ;;  %v349_v44 = vpack.c.bf16 %v329_v41, %v343_v43  ;;  %v348_v45 = vld [vmem:[#allocation2 + $0x28] sm:$0xff] }
  0x24   : > { %865 = vmatpush3.bf16.msra.mxu1 %v903_v33  ;;  %v351_v46 = vpack.c.bf16 %v348_v45, %v337_v42 }
  0x26   : > { %584 = vmatmul.mubr.bf16.vlgmr.msra.gmra.mrb[0].mxu0 %v349_v44 }
  0x27   : > { %867 = vmatmul.mubr.bf16.vlgmr.msra.gmra.mrb[0].mxu1 %v351_v46 }
  0xf9   : > { %v835_v47 = vpop.f32.mrb[0].mxu0 }
  0xfa   : > { %v836_v48 = vpop.f32.mrb[1].mxu0  ;;  %v626_v50 = vpop.f32.mrb[0].mxu1 }
  0xfb   : > { %v837_v51 = vadd.f32 %v836_v48, %v835_v47  ;;  %v838_v52 = vpop.f32.mrb[2].mxu0  ;;  %v868_v53 = vpop.f32.mrb[1].mxu1 }
  0xfc   : > { %v839_v54 = vpop.f32.mrb[3].mxu0  ;;  %v629_v55 = vpop.f32.mrb[2].mxu1 }
  0xfd   : > { %v586_v56 = vadd.f32 %v837_v51, %v777_v49  ;;  %v840_v57 = vadd.f32 %v839_v54, %v838_v52  ;;  %v869_v58 = vpop.f32.mrb[3].mxu1 }
  0xff   : > { %v627_v59 = vadd.f32 %v626_v50, %v586_v56  ;;  %v589_v60 = vadd.f32 %v840_v57, %v777_v49 }
 0x101   : > { %v630_v61 = vadd.f32 %v629_v55, %v589_v60  ;;  %v651_v62 = vmul.f32 %v627_v59, %v627_v59 }
 0x103   : > { %v817_v63 = vpack.c.bf16 %v630_v61, %v627_v59  ;;  %v643_v0 = vadd.f32 %v630_v61, %v627_v59  ;;  %v652_v1 = vmul.f32 %v630_v61, %v630_v61 }
 0x105   : > { %818 = vst [vmem:[%s289_s22] sm:$0xff] %v817_v63   ;;  %v644_v2 = vrot.slane %v643_v0, 4  ;;  %v653_v3 = vadd.f32 %v652_v1, %v651_v62 }
 0x107   : > { %v645_v4 = vadd.f32 %v644_v2, %v643_v0  ;;  %v654_v5 = vrot.slane %v653_v3, 4 }
 0x109   : > { %v646_v6 = vrot.slane %v645_v4, 2  ;;  %v655_v7 = vadd.f32 %v654_v5, %v653_v3 }
 0x10b   : > { %v647_v8 = vadd.f32 %v646_v6, %v645_v4  ;;  %v656_v9 = vrot.slane %v655_v7, 2 }
 0x10d   : > { %v648_v10 = vrot.slane %v647_v8, 1  ;;  %v657_v11 = vadd.f32 %v656_v9, %v655_v7 }
 0x10f   : > { %v649_v12 = vadd.f32 %v648_v10, %v647_v8  ;;  %v658_v13 = vrot.slane %v657_v11, 1 }
 0x111   : > { %650 = vst [vmem:[%s292_s14] sm:$0x1] %v649_v12  ;;  %v659_v14 = vadd.f32 %v658_v13, %v657_v11 }
 0x113   : > { %660 = vst [vmem:[%s295_s29] sm:$0x1] %v659_v14 }
 0x114 PF: > { %s18_s24 = sadd.s32 1, %s910_s24  }
 0x115   : > { %p15_p4 = scmp.ge.s32.totalorder %s18_s24, 4  }
 0x117   :  { %17 = sbr.rel (!%p15_p4) target bundleno = 1 (0x1), region = 94 }

// kernel: double_conv_forward.5
= control target key start
LH: loop header
LB: loop body
LE: loop exit
PB: predicated region body
PF: predicated region fallthrough
CT: control target
= control target key end

     0   :  { %s111_s0 = inlined_call_operand.vmem [shape: bf16[32,128], index: 0, kind: input, shape index: {}]   ;;  %s112_s1 = inlined_call_operand.vmem [shape: f32[1,128], index: 1, kind: input, shape index: {}]   ;;  %s113_s2 = inlined_call_operand.vmem [shape: f32[1,128], index: 2, kind: input, shape index: {}]   ;;  %s114_s3 = inlined_call_operand.vmem [shape: f32[32,128], index: 3, kind: output, shape index: {}]  }
   0x1   :  { %v59_v0 = vld [vmem:[%s111_s0] sm:$0xff]   ;;  %v66_v4 = vld [vmem:[%s111_s0 + $0x8] sm:$0xff]  }
   0x2   :  { %v56_v1 = vld [vmem:[%s112_s1] ss:$0 sm:$0xff]  ;;  %v60_v2 = vunpack.c.l.bf16 %v59_v0  ;;  %v61_v3 = vunpack.c.h.bf16 %v59_v0  ;;  %v64_v6 = vunpack.c.l.bf16 %v66_v4  ;;  %v65_v7 = vunpack.c.h.bf16 %v66_v4 }
   0x3   :  { %v57_v5 = vld [vmem:[%s113_s2] ss:$0 sm:$0xff] }
   0x4   :  { %v29_v8 = vmul.f32 %v60_v2, %v56_v1  ;;  %v30_v9 = vmul.f32 %v61_v3, %v56_v1  ;;  %v31_v10 = vmul.f32 %v64_v6, %v56_v1  ;;  %v32_v11 = vmul.f32 %v65_v7, %v56_v1 }
   0x6   :  { %v40_v12 = vadd.f32 %v57_v5, %v29_v8  ;;  %v41_v13 = vadd.f32 %v57_v5, %v30_v9  ;;  %v42_v14 = vadd.f32 %v57_v5, %v31_v10  ;;  %v43_v15 = vadd.f32 %v57_v5, %v32_v11 }
   0x8   :  { %v44_v16 = vmax.f32 %v40_v12, 0.0  ;;  %v45_v17 = vmax.f32 %v41_v13, 0.0  ;;  %v46_v18 = vmax.f32 %v42_v14, 0.0  ;;  %v47_v19 = vmax.f32 %v43_v15, 0.0 }
   0xa   :  { %48 = vst [vmem:[%s114_s3] sm:$0xff] %v44_v16  ;;  %49 = vst [vmem:[%s114_s3 + $0x8] sm:$0xff] %v45_v17 }
   0xb   :  { %50 = vst [vmem:[%s114_s3 + $0x10] sm:$0xff] %v46_v18  ;;  %51 = vst [vmem:[%s114_s3 + $0x18] sm:$0xff] %v47_v19 }

</bundles_post_ra>
